<compile_context>
chip_gen: v7x
topology: tpu7x:2x2x1
jax: 0.10.0
libtpu: 0.0.40
codegen_flags: <defaults>
</compile_context>

<pallas_src>
import functools

import jax
import jax.numpy as jnp
from jax.experimental import pallas as pl
from jax.experimental.pallas import tpu as pltpu

V = 128   # vocab size (lane-aligned)
H = 128   # embedding / hidden dim (lane-aligned)
SOS = 1
EOS = 3   # kept for parity with the module; unused in forward

MAX_TILE_M = 1024  # decoder rows per grid step (multiple of 8)


def _round_up(n, m):
    return ((n + m - 1) // m) * m


def _pick_tile(n, max_tile=MAX_TILE_M):
    return min(max_tile, _round_up(n, 8))


# ----------------------------- encoder kernel ------------------------------

def _encoder_mean_kernel(ids_ref, emb_ref, w_ref, b_ref, o_ref):
    # ids: (1, S, 1) i32, emb: (V, H) bf16, w: (H, H) bf16, b: (1, H) f32
    # o:   (1, 1, H) bf16  -- mean over S of tanh(emb[x] @ W + b)
    ids = ids_ref[0]                                             # (S, 1)
    s = ids.shape[0]
    vocab_iota = jax.lax.broadcasted_iota(jnp.int32, (s, V), 1)
    onehot = (vocab_iota == ids).astype(jnp.bfloat16)            # (S, V)
    # embedding lookup as a one-hot matmul (exact bf16 row select on the MXU)
    x_emb = jnp.dot(onehot, emb_ref[...], preferred_element_type=jnp.float32)
    h = jnp.tanh(jnp.dot(x_emb.astype(jnp.bfloat16), w_ref[...],
                         preferred_element_type=jnp.float32) + b_ref[...])
    o_ref[0] = jnp.mean(h, axis=0, keepdims=True).astype(o_ref.dtype)


def encoder_mean(x, emb_enc, w_enc, b_enc):
    """Per-batch mean of tanh(emb(x) @ W_enc + b_enc); returns (B, H) bf16."""
    b, s = x.shape
    ids = x.reshape(b, s, 1).astype(jnp.int32)
    out = pl.pallas_call(
        _encoder_mean_kernel,
        out_shape=jax.ShapeDtypeStruct((b, 1, H), jnp.bfloat16),
        grid=(b,),
        in_specs=[
            pl.BlockSpec((1, s, 1), lambda i: (i, 0, 0)),   # token ids (pipelined)
            pl.BlockSpec((V, H), lambda i: (0, 0)),          # emb table (resident)
            pl.BlockSpec((H, H), lambda i: (0, 0)),          # W_enc (resident)
            pl.BlockSpec((1, H), lambda i: (0, 0)),          # b_enc (resident)
        ],
        out_specs=pl.BlockSpec((1, 1, H), lambda i: (i, 0, 0)),
        compiler_params=pltpu.CompilerParams(
            dimension_semantics=("parallel",)),
    )(ids, emb_enc.astype(jnp.bfloat16), w_enc.astype(jnp.bfloat16),
      b_enc.reshape(1, -1).astype(jnp.float32))
    return out.reshape(b, H)


# ----------------------- fused decoder + CE kernel --------------------------

def _decoder_ce_kernel(seq_len_p1, num_b, ids_ref, emb_ref, ctx_ref,
                       wd_ref, bd_ref, wo_ref, bo_ref, part_ref):
    # ids: (TM, 2) i32  [col 0 = dec_inp token, col 1 = dec_tgt token]
    # emb: (V, H) bf16, ctx: (num_b, H) bf16 (per-batch encoder mean)
    # wd:  (H, H) bf16, bd: (1, H) f32, wo: (H, V) bf16, bo: (1, V) f32
    # part: (1, 8, 128) f32  -- [0,0,0] = tile loss_sum, [0,0,1] = tile count
    i = pl.program_id(0)
    tm = ids_ref.shape[0]
    dec_ids = ids_ref[:, 0:1]                                     # (tm, 1)
    tgt_ids = ids_ref[:, 1:2]                                     # (tm, 1)

    # --- token embedding: one-hot(ids) @ emb table (MXU) ---
    vocab_iota = jax.lax.broadcasted_iota(jnp.int32, (tm, V), 1)
    tok_onehot = (vocab_iota == dec_ids).astype(jnp.bfloat16)     # (tm, V)
    d_emb = jnp.dot(tok_onehot, emb_ref[...],
                    preferred_element_type=jnp.float32)           # (tm, H) f32

    # --- per-row encoder context: batch one-hot from row ranges (no int div,
    #     no gather) @ resident (num_b, H) mean.  Padded rows select nothing.
    # TODO(synk): for very large B a DMA-gather of ctx rows would scale better
    #             than the O(tm*B) one-hot select.
    row = jax.lax.broadcasted_iota(jnp.int32, (tm, num_b), 0) + i * tm
    start = jax.lax.broadcasted_iota(jnp.int32, (tm, num_b), 1) * seq_len_p1
    b_onehot = ((row >= start) & (row < start + seq_len_p1)).astype(jnp.bfloat16)
    ctx = jnp.dot(b_onehot, ctx_ref[...],
                  preferred_element_type=jnp.float32)             # (tm, H) f32

    # --- decoder linear + tanh, output projection (f32 accumulate) ---
    d_in = (d_emb + ctx).astype(jnp.bfloat16)
    h = jnp.tanh(jnp.dot(d_in, wd_ref[...],
                         preferred_element_type=jnp.float32) + bd_ref[...])
    logits = jnp.dot(h.astype(jnp.bfloat16), wo_ref[...],
                     preferred_element_type=jnp.float32) + bo_ref[...]

    # --- masked cross-entropy (ignore_index=0), per-tile partial sums ---
    mx = jnp.max(logits, axis=-1, keepdims=True)
    lse = mx + jnp.log(jnp.sum(jnp.exp(logits - mx), axis=-1, keepdims=True))
    tgt_logit = jnp.sum(jnp.where(vocab_iota == tgt_ids, logits, 0.0),
                        axis=-1, keepdims=True)
    valid = (tgt_ids != 0).astype(jnp.float32)

    loss_sum = jnp.sum((lse - tgt_logit) * valid)
    cnt = jnp.sum(valid)

    r8 = jax.lax.broadcasted_iota(jnp.int32, (8, 128), 0)
    c128 = jax.lax.broadcasted_iota(jnp.int32, (8, 128), 1)
    part_ref[0] = jnp.where((r8 == 0) & (c128 == 0), loss_sum,
                            jnp.where((r8 == 0) & (c128 == 1), cnt, 0.0))


def decoder_ce(dec_inp, dec_tgt, enc_mean, emb_dec, w_dec, b_dec, w_out, b_out):
    """Fused embedding + context add + decoder linear/tanh + vocab projection
    + masked-mean cross-entropy (ignore_index=0)."""
    b, sp1 = dec_inp.shape
    n = b * sp1
    ids = jnp.stack([dec_inp.reshape(-1), dec_tgt.reshape(-1)],
                    axis=1).astype(jnp.int32)                      # (n, 2)
    tm = _pick_tile(n)
    n_pad = _round_up(n, tm)
    if n_pad != n:
        ids = jnp.pad(ids, ((0, n_pad - n), (0, 0)))   # pad target 0 => ignored
    n_tiles = n_pad // tm

    # pad batch dim of the context to a multiple of 8 (tile-aligned resident)
    b_pad = _round_up(b, 8)
    ctx = enc_mean.astype(jnp.bfloat16)
    if b_pad != b:
        ctx = jnp.pad(ctx, ((0, b_pad - b), (0, 0)))

    kernel = functools.partial(_decoder_ce_kernel, sp1, b_pad)
    part = pl.pallas_call(
        kernel,
        out_shape=jax.ShapeDtypeStruct((n_tiles, 8, 128), jnp.float32),
        grid=(n_tiles,),
        in_specs=[
            pl.BlockSpec((tm, 2), lambda i: (i, 0)),        # token ids (pipelined)
            pl.BlockSpec((V, H), lambda i: (0, 0)),          # emb_dec (resident)
            pl.BlockSpec((b_pad, H), lambda i: (0, 0)),      # enc ctx (resident)
            pl.BlockSpec((H, H), lambda i: (0, 0)),          # W_dec (resident)
            pl.BlockSpec((1, H), lambda i: (0, 0)),          # b_dec (resident)
            pl.BlockSpec((H, V), lambda i: (0, 0)),          # W_out (resident)
            pl.BlockSpec((1, V), lambda i: (0, 0)),          # b_out (resident)
        ],
        out_specs=pl.BlockSpec((1, 8, 128), lambda i: (i, 0, 0)),
        compiler_params=pltpu.CompilerParams(
            dimension_semantics=("parallel",)),   # no carried state -> v7x 2-TC
    )(ids, emb_dec.astype(jnp.bfloat16), ctx,
      w_dec.astype(jnp.bfloat16), b_dec.reshape(1, -1).astype(jnp.float32),
      w_out.astype(jnp.bfloat16), b_out.reshape(1, -1).astype(jnp.float32))

    # tiny final reduction (num_tiles elements); NaN if no non-ignored targets,
    # matching PyTorch's ignore_index 'mean' behavior.
    return jnp.sum(part[:, 0, 0]) / jnp.sum(part[:, 0, 1])


# ------------------------------ parameters ---------------------------------

def init_params(key):
    ks = jax.random.split(key, 5)
    s = 0.05
    return {
        "emb_enc": jax.random.normal(ks[0], (V, H), jnp.float32) * s,
        "w_enc":   jax.random.normal(ks[1], (H, H), jnp.float32) * s,
        "b_enc":   jnp.zeros((H,), jnp.float32),
        "emb_dec": jax.random.normal(ks[2], (V, H), jnp.float32) * s,
        "w_dec":   jax.random.normal(ks[3], (H, H), jnp.float32) * s,
        "b_dec":   jnp.zeros((H,), jnp.float32),
        "w_out":   jax.random.normal(ks[4], (H, V), jnp.float32) * s,
        "b_out":   jnp.zeros((V,), jnp.float32),
    }


# ------------------------------- forward -----------------------------------

@jax.jit
def autoencoder_forward(params, x, tgt):
    # `tgt` is accepted for signature parity with the PyTorch forward but,
    # exactly as in the reference module, it is not used.
    del tgt
    B, S = x.shape

    # dec_inp = cat([SOS column, x]); dec_tgt = cat([x, 0 column])
    sos_col = jnp.full((B, 1), SOS, dtype=x.dtype)
    pad_col = jnp.zeros((B, 1), dtype=x.dtype)
    dec_inp = jnp.concatenate([sos_col, x], axis=1)          # [B, S+1]
    dec_tgt = jnp.concatenate([x, pad_col], axis=1)          # [B, S+1]

    # encoder: per-batch mean of tanh(emb(x) @ W_enc + b_enc), all in-kernel
    enc_mean = encoder_mean(x, params["emb_enc"], params["w_enc"],
                            params["b_enc"])                  # (B, H) bf16

    # fused decoder + output projection + masked mean CE (ignore_index=0);
    # padding handled via the `valid` term (same loss as the reference's
    # dec_tgt.ne(0) mask path).
    loss = decoder_ce(dec_inp, dec_tgt, enc_mean,
                      params["emb_dec"], params["w_dec"], params["b_dec"],
                      params["w_out"], params["b_out"])
    return loss


if __name__ == "__main__":
    key = jax.random.PRNGKey(0)
    pkey, xkey = jax.random.split(key)
    params = init_params(pkey)

    B, S = 2, 8
    # token ids in [1, V); force a couple of padding zeros to exercise
    # ignore_index=0 in the cross-entropy.
    x = jax.random.randint(xkey, (B, S), 1, V, dtype=jnp.int32)
    x = x.at[0, S - 1].set(0)
    x = x.at[1, S - 2].set(0)
    tgt = x  # unused by forward (mirrors the reference module)

    loss = autoencoder_forward(params, x, tgt)
    jax.block_until_ready(loss)
    assert loss.shape == () and bool(jnp.isfinite(loss))
    print("KERNEL_OK")
</pallas_src>

<mosaic_0001>
module attributes {stable_mosaic.version = 11 : i64} {
  func.func @_encoder_mean_kernel(%arg0: i32, %arg1: memref<1x8x1xi32, #tpu.memory_space<vmem>>, %arg2: memref<128x128xbf16, #tpu.memory_space<vmem>>, %arg3: memref<128x128xbf16, #tpu.memory_space<vmem>>, %arg4: memref<1x128xf32, #tpu.memory_space<vmem>>, %arg5: memref<1x1x128xbf16, #tpu.memory_space<vmem>>) attributes {dimension_semantics = [#tpu.dimension_semantics<parallel>], iteration_bounds = array<i64: 2>, scalar_prefetch = 0 : i64, scratch_operands = 0 : i64, tpu.core_type = #tpu.core_type<tc>, window_params = [{transform_indices = @transform_0, window_bounds = array<i64: 1, 8, 1>}, {pipeline_mode = #tpu.pipeline_mode<synchronous>, transform_indices = @transform_1, window_bounds = array<i64: 128, 128>}, {pipeline_mode = #tpu.pipeline_mode<synchronous>, transform_indices = @transform_2, window_bounds = array<i64: 128, 128>}, {pipeline_mode = #tpu.pipeline_mode<synchronous>, transform_indices = @transform_3, window_bounds = array<i64: 1, 128>}, {transform_indices = @transform_4, window_bounds = array<i64: 1, 1, 128>}]} {
    %c0 = arith.constant 0 : index
    %c0_0 = arith.constant 0 : index
    %c0_1 = arith.constant 0 : index
    %0 = vector.load %arg1[%c0, %c0_0, %c0_1] : memref<1x8x1xi32, #tpu.memory_space<vmem>>, vector<1x8x1xi32>
    %1 = vector.shape_cast %0 : vector<1x8x1xi32> to vector<8x1xi32>
    %2 = tpu.iota {dimensions = array<i32: 1>} : vector<8x128xi32>
    %3 = vector.broadcast %1 : vector<8x1xi32> to vector<8x128xi32>
    %4 = arith.cmpi eq, %2, %3 : vector<8x128xi32>
    %5 = arith.extui %4 : vector<8x128xi1> to vector<8x128xi32>
    %6 = arith.sitofp %5 : vector<8x128xi32> to vector<8x128xf32>
    %7 = arith.truncf %6 : vector<8x128xf32> to vector<8x128xbf16>
    %c0_2 = arith.constant 0 : index
    %c0_3 = arith.constant 0 : index
    %8 = vector.load %arg2[%c0_2, %c0_3] : memref<128x128xbf16, #tpu.memory_space<vmem>>, vector<128x128xbf16>
    %cst = arith.constant dense<0.000000e+00> : vector<8x128xf32>
    %9 = tpu.matmul %7, %8, %cst {dimension_numbers = #tpu.dot_dimension_numbers<[1], [0], [0], [1], [0, 0, 1, 1], [], []>} : vector<8x128xbf16>, vector<128x128xbf16>, vector<8x128xf32> -> vector<8x128xf32>
    %10 = arith.truncf %9 : vector<8x128xf32> to vector<8x128xbf16>
    %c0_4 = arith.constant 0 : index
    %c0_5 = arith.constant 0 : index
    %11 = vector.load %arg3[%c0_4, %c0_5] : memref<128x128xbf16, #tpu.memory_space<vmem>>, vector<128x128xbf16>
    %cst_6 = arith.constant dense<0.000000e+00> : vector<8x128xf32>
    %12 = tpu.matmul %10, %11, %cst_6 {dimension_numbers = #tpu.dot_dimension_numbers<[1], [0], [0], [1], [0, 0, 1, 1], [], []>} : vector<8x128xbf16>, vector<128x128xbf16>, vector<8x128xf32> -> vector<8x128xf32>
    %c0_7 = arith.constant 0 : index
    %c0_8 = arith.constant 0 : index
    %13 = vector.load %arg4[%c0_7, %c0_8] : memref<1x128xf32, #tpu.memory_space<vmem>>, vector<1x128xf32>
    %14 = vector.broadcast %13 : vector<1x128xf32> to vector<8x128xf32>
    %15 = arith.addf %12, %14 : vector<8x128xf32>
    %16 = math.tanh %15 : vector<8x128xf32>
    %cst_9 = arith.constant dense<0.000000e+00> : vector<128xf32>
    %17 = vector.multi_reduction <add>, %16, %cst_9 [0] : vector<8x128xf32> to vector<128xf32>
    %18 = vector.shape_cast %17 : vector<128xf32> to vector<1x128xf32>
    %cst_10 = arith.constant 8.000000e+00 : f32
    %19 = vector.broadcast %cst_10 : f32 to vector<1x128xf32>
    %20 = arith.divf %18, %19 : vector<1x128xf32>
    %21 = arith.truncf %20 : vector<1x128xf32> to vector<1x128xbf16>
    %c0_11 = arith.constant 0 : index
    %c0_12 = arith.constant 0 : index
    %c0_13 = arith.constant 0 : index
    %22 = vector.load %arg5[%c0_11, %c0_12, %c0_13] : memref<1x1x128xbf16, #tpu.memory_space<vmem>>, vector<1x1x128xbf16>
    %23 = vector.shape_cast %22 : vector<1x1x128xbf16> to vector<1x128xbf16>
    %24 = vector.shape_cast %21 : vector<1x128xbf16> to vector<1x1x128xbf16>
    tpu.vector_store %arg5[%c0_11, %c0_12, %c0_13], %24 {strides = array<i32>} : memref<1x1x128xbf16, #tpu.memory_space<vmem>>, vector<1x1x128xbf16>,
    return
  }
  func.func @transform_0(%arg0: i32) -> (i32, i32, i32) {
    %c0_i32 = arith.constant 0 : i32
    %c0_i32_0 = arith.constant 0 : i32
    %c0_i32_1 = arith.constant 0 : i32
    return %arg0, %c0_i32, %c0_i32_0 : i32, i32, i32
  }
  func.func @transform_1(%arg0: i32) -> (i32, i32) {
    %c0_i32 = arith.constant 0 : i32
    %c0_i32_0 = arith.constant 0 : i32
    %c0_i32_1 = arith.constant 0 : i32
    return %c0_i32, %c0_i32_0 : i32, i32
  }
  func.func @transform_2(%arg0: i32) -> (i32, i32) {
    %c0_i32 = arith.constant 0 : i32
    %c0_i32_0 = arith.constant 0 : i32
    %c0_i32_1 = arith.constant 0 : i32
    return %c0_i32, %c0_i32_0 : i32, i32
  }
  func.func @transform_3(%arg0: i32) -> (i32, i32) {
    %c0_i32 = arith.constant 0 : i32
    %c0_i32_0 = arith.constant 0 : i32
    %c0_i32_1 = arith.constant 0 : i32
    return %c0_i32, %c0_i32_0 : i32, i32
  }
  func.func @transform_4(%arg0: i32) -> (i32, i32, i32) {
    %c0_i32 = arith.constant 0 : i32
    %c0_i32_0 = arith.constant 0 : i32
    %c0_i32_1 = arith.constant 0 : i32
    return %arg0, %c0_i32, %c0_i32_0 : i32, i32, i32
  }
}

module attributes {stable_mosaic.version = 11 : i64} {
  func.func @_decoder_ce_kernel(%arg0: i32, %arg1: memref<24x2xi32, #tpu.memory_space<vmem>>, %arg2: memref<128x128xbf16, #tpu.memory_space<vmem>>, %arg3: memref<8x128xbf16, #tpu.memory_space<vmem>>, %arg4: memref<128x128xbf16, #tpu.memory_space<vmem>>, %arg5: memref<1x128xf32, #tpu.memory_space<vmem>>, %arg6: memref<128x128xbf16, #tpu.memory_space<vmem>>, %arg7: memref<1x128xf32, #tpu.memory_space<vmem>>, %arg8: memref<1x8x128xf32, #tpu.memory_space<vmem>>) attributes {dimension_semantics = [#tpu.dimension_semantics<parallel>], iteration_bounds = array<i64: 1>, scalar_prefetch = 0 : i64, scratch_operands = 0 : i64, tpu.core_type = #tpu.core_type<tc>, window_params = [{transform_indices = @transform_0, window_bounds = array<i64: 24, 2>}, {pipeline_mode = #tpu.pipeline_mode<synchronous>, transform_indices = @transform_1, window_bounds = array<i64: 128, 128>}, {pipeline_mode = #tpu.pipeline_mode<synchronous>, transform_indices = @transform_2, window_bounds = array<i64: 8, 128>}, {pipeline_mode = #tpu.pipeline_mode<synchronous>, transform_indices = @transform_3, window_bounds = array<i64: 128, 128>}, {pipeline_mode = #tpu.pipeline_mode<synchronous>, transform_indices = @transform_4, window_bounds = array<i64: 1, 128>}, {pipeline_mode = #tpu.pipeline_mode<synchronous>, transform_indices = @transform_5, window_bounds = array<i64: 128, 128>}, {pipeline_mode = #tpu.pipeline_mode<synchronous>, transform_indices = @transform_6, window_bounds = array<i64: 1, 128>}, {transform_indices = @transform_7, window_bounds = array<i64: 1, 8, 128>}]} {
    %c0 = arith.constant 0 : index
    %c0_0 = arith.constant 0 : index
    %0 = vector.load %arg1[%c0, %c0_0] : memref<24x2xi32, #tpu.memory_space<vmem>>, vector<24x1xi32>
    %c0_1 = arith.constant 0 : index
    %c1 = arith.constant 1 : index
    %1 = vector.load %arg1[%c0_1, %c1] : memref<24x2xi32, #tpu.memory_space<vmem>>, vector<24x1xi32>
    %2 = tpu.iota {dimensions = array<i32: 1>} : vector<24x128xi32>
    %3 = vector.broadcast %0 : vector<24x1xi32> to vector<24x128xi32>
    %4 = arith.cmpi eq, %2, %3 : vector<24x128xi32>
    %5 = arith.extui %4 : vector<24x128xi1> to vector<24x128xi32>
    %6 = arith.sitofp %5 : vector<24x128xi32> to vector<24x128xf32>
    %7 = arith.truncf %6 : vector<24x128xf32> to vector<24x128xbf16>
    %c0_2 = arith.constant 0 : index
    %c0_3 = arith.constant 0 : index
    %8 = vector.load %arg2[%c0_2, %c0_3] : memref<128x128xbf16, #tpu.memory_space<vmem>>, vector<128x128xbf16>
    %cst = arith.constant dense<0.000000e+00> : vector<24x128xf32>
    %9 = tpu.matmul %7, %8, %cst {dimension_numbers = #tpu.dot_dimension_numbers<[1], [0], [0], [1], [0, 0, 1, 1], [], []>} : vector<24x128xbf16>, vector<128x128xbf16>, vector<24x128xf32> -> vector<24x128xf32>
    %10 = tpu.iota {dimensions = array<i32: 0>} : vector<24x8xi32>
    %c24_i32 = arith.constant 24 : i32
    %11 = arith.muli %arg0, %c24_i32 : i32
    %12 = vector.broadcast %11 : i32 to vector<24x8xi32>
    %13 = arith.addi %10, %12 : vector<24x8xi32>
    %14 = tpu.iota {dimensions = array<i32: 1>} : vector<24x8xi32>
    %c9_i32 = arith.constant 9 : i32
    %15 = vector.broadcast %c9_i32 : i32 to vector<24x8xi32>
    %16 = arith.muli %14, %15 : vector<24x8xi32>
    %17 = arith.cmpi sge, %13, %16 : vector<24x8xi32>
    %c9_i32_4 = arith.constant 9 : i32
    %18 = vector.broadcast %c9_i32_4 : i32 to vector<24x8xi32>
    %19 = arith.addi %16, %18 : vector<24x8xi32>
    %20 = arith.cmpi slt, %13, %19 : vector<24x8xi32>
    %21 = arith.andi %17, %20 : vector<24x8xi1>
    %22 = arith.extui %21 : vector<24x8xi1> to vector<24x8xi32>
    %23 = arith.sitofp %22 : vector<24x8xi32> to vector<24x8xf32>
    %24 = arith.truncf %23 : vector<24x8xf32> to vector<24x8xbf16>
    %c0_5 = arith.constant 0 : index
    %c0_6 = arith.constant 0 : index
    %25 = vector.load %arg3[%c0_5, %c0_6] : memref<8x128xbf16, #tpu.memory_space<vmem>>, vector<8x128xbf16>
    %cst_7 = arith.constant dense<0.000000e+00> : vector<24x128xf32>
    %26 = tpu.matmul %24, %25, %cst_7 {dimension_numbers = #tpu.dot_dimension_numbers<[1], [0], [0], [1], [0, 0, 1, 1], [], []>} : vector<24x8xbf16>, vector<8x128xbf16>, vector<24x128xf32> -> vector<24x128xf32>
    %27 = arith.addf %9, %26 : vector<24x128xf32>
    %28 = arith.truncf %27 : vector<24x128xf32> to vector<24x128xbf16>
    %c0_8 = arith.constant 0 : index
    %c0_9 = arith.constant 0 : index
    %29 = vector.load %arg4[%c0_8, %c0_9] : memref<128x128xbf16, #tpu.memory_space<vmem>>, vector<128x128xbf16>
    %cst_10 = arith.constant dense<0.000000e+00> : vector<24x128xf32>
    %30 = tpu.matmul %28, %29, %cst_10 {dimension_numbers = #tpu.dot_dimension_numbers<[1], [0], [0], [1], [0, 0, 1, 1], [], []>} : vector<24x128xbf16>, vector<128x128xbf16>, vector<24x128xf32> -> vector<24x128xf32>
    %c0_11 = arith.constant 0 : index
    %c0_12 = arith.constant 0 : index
    %31 = vector.load %arg5[%c0_11, %c0_12] : memref<1x128xf32, #tpu.memory_space<vmem>>, vector<1x128xf32>
    %32 = vector.broadcast %31 : vector<1x128xf32> to vector<24x128xf32>
    %33 = arith.addf %30, %32 : vector<24x128xf32>
    %34 = math.tanh %33 : vector<24x128xf32>
    %35 = arith.truncf %34 : vector<24x128xf32> to vector<24x128xbf16>
    %c0_13 = arith.constant 0 : index
    %c0_14 = arith.constant 0 : index
    %36 = vector.load %arg6[%c0_13, %c0_14] : memref<128x128xbf16, #tpu.memory_space<vmem>>, vector<128x128xbf16>
    %cst_15 = arith.constant dense<0.000000e+00> : vector<24x128xf32>
    %37 = tpu.matmul %35, %36, %cst_15 {dimension_numbers = #tpu.dot_dimension_numbers<[1], [0], [0], [1], [0, 0, 1, 1], [], []>} : vector<24x128xbf16>, vector<128x128xbf16>, vector<24x128xf32> -> vector<24x128xf32>
    %c0_16 = arith.constant 0 : index
    %c0_17 = arith.constant 0 : index
    %38 = vector.load %arg7[%c0_16, %c0_17] : memref<1x128xf32, #tpu.memory_space<vmem>>, vector<1x128xf32>
    %39 = vector.broadcast %38 : vector<1x128xf32> to vector<24x128xf32>
    %40 = arith.addf %37, %39 : vector<24x128xf32>
    %cst_18 = arith.constant dense<0xFF800000> : vector<24xf32>
    %41 = vector.multi_reduction <maximumf>, %40, %cst_18 [1] : vector<24x128xf32> to vector<24xf32>
    %42 = vector.shape_cast %41 : vector<24xf32> to vector<24x1xf32>
    %43 = vector.broadcast %42 : vector<24x1xf32> to vector<24x128xf32>
    %44 = arith.subf %40, %43 : vector<24x128xf32>
    %45 = math.exp %44 : vector<24x128xf32>
    %cst_19 = arith.constant dense<0.000000e+00> : vector<24xf32>
    %46 = vector.multi_reduction <add>, %45, %cst_19 [1] : vector<24x128xf32> to vector<24xf32>
    %47 = vector.shape_cast %46 : vector<24xf32> to vector<24x1xf32>
    %48 = math.log %47 : vector<24x1xf32>
    %49 = arith.addf %42, %48 : vector<24x1xf32>
    %50 = vector.broadcast %1 : vector<24x1xi32> to vector<24x128xi32>
    %51 = arith.cmpi eq, %2, %50 : vector<24x128xi32>
    %cst_20 = arith.constant 0.000000e+00 : f32
    %52 = vector.broadcast %cst_20 : f32 to vector<24x128xf32>
    %53 = arith.select %51, %40, %52 : vector<24x128xi1>, vector<24x128xf32>
    %cst_21 = arith.constant dense<0.000000e+00> : vector<24xf32>
    %54 = vector.multi_reduction <add>, %53, %cst_21 [1] : vector<24x128xf32> to vector<24xf32>
    %55 = vector.shape_cast %54 : vector<24xf32> to vector<24x1xf32>
    %c0_i32 = arith.constant 0 : i32
    %56 = vector.broadcast %c0_i32 : i32 to vector<24x1xi32>
    %57 = arith.cmpi ne, %1, %56 : vector<24x1xi32>
    %58 = arith.extui %57 : vector<24x1xi1> to vector<24x1xi32>
    %59 = arith.sitofp %58 : vector<24x1xi32> to vector<24x1xf32>
    %60 = arith.subf %49, %55 : vector<24x1xf32>
    %61 = arith.mulf %60, %59 : vector<24x1xf32>
    %62 = vector.shape_cast %61 : vector<24x1xf32> to vector<1x24x1xf32>
    %cst_22 = arith.constant dense<0.000000e+00> : vector<1xf32>
    %63 = vector.multi_reduction <add>, %62, %cst_22 [1, 2] : vector<1x24x1xf32> to vector<1xf32>
    %64 = vector.shape_cast %63 : vector<1xf32> to vector<1x1x1xf32>
    %65 = vector.extract %64[0, 0, 0] : f32 from vector<1x1x1xf32>
    %66 = vector.shape_cast %59 : vector<24x1xf32> to vector<1x24x1xf32>
    %cst_23 = arith.constant dense<0.000000e+00> : vector<1xf32>
    %67 = vector.multi_reduction <add>, %66, %cst_23 [1, 2] : vector<1x24x1xf32> to vector<1xf32>
    %68 = vector.shape_cast %67 : vector<1xf32> to vector<1x1x1xf32>
    %69 = vector.extract %68[0, 0, 0] : f32 from vector<1x1x1xf32>
    %70 = tpu.iota {dimensions = array<i32: 0>} : vector<8x128xi32>
    %71 = tpu.iota {dimensions = array<i32: 1>} : vector<8x128xi32>
    %c0_i32_24 = arith.constant 0 : i32
    %72 = vector.broadcast %c0_i32_24 : i32 to vector<8x128xi32>
    %73 = arith.cmpi eq, %70, %72 : vector<8x128xi32>
    %c0_i32_25 = arith.constant 0 : i32
    %74 = vector.broadcast %c0_i32_25 : i32 to vector<8x128xi32>
    %75 = arith.cmpi eq, %71, %74 : vector<8x128xi32>
    %76 = arith.andi %73, %75 : vector<8x128xi1>
    %c0_i32_26 = arith.constant 0 : i32
    %77 = vector.broadcast %c0_i32_26 : i32 to vector<8x128xi32>
    %78 = arith.cmpi eq, %70, %77 : vector<8x128xi32>
    %c1_i32 = arith.constant 1 : i32
    %79 = vector.broadcast %c1_i32 : i32 to vector<8x128xi32>
    %80 = arith.cmpi eq, %71, %79 : vector<8x128xi32>
    %81 = arith.andi %78, %80 : vector<8x128xi1>
    %cst_27 = arith.constant 0.000000e+00 : f32
    %82 = vector.broadcast %69 : f32 to vector<8x128xf32>
    %83 = vector.broadcast %cst_27 : f32 to vector<8x128xf32>
    %84 = arith.select %81, %82, %83 : vector<8x128xi1>, vector<8x128xf32>
    %85 = vector.broadcast %65 : f32 to vector<8x128xf32>
    %86 = arith.select %76, %85, %84 : vector<8x128xi1>, vector<8x128xf32>
    %c0_28 = arith.constant 0 : index
    %c0_29 = arith.constant 0 : index
    %c0_30 = arith.constant 0 : index
    %87 = vector.load %arg8[%c0_28, %c0_29, %c0_30] : memref<1x8x128xf32, #tpu.memory_space<vmem>>, vector<1x8x128xf32>
    %88 = vector.shape_cast %87 : vector<1x8x128xf32> to vector<8x128xf32>
    %89 = vector.shape_cast %86 : vector<8x128xf32> to vector<1x8x128xf32>
    tpu.vector_store %arg8[%c0_28, %c0_29, %c0_30], %89 {strides = array<i32>} : memref<1x8x128xf32, #tpu.memory_space<vmem>>, vector<1x8x128xf32>,
    return
  }
  func.func @transform_0(%arg0: i32) -> (i32, i32) {
    %c0_i32 = arith.constant 0 : i32
    %c0_i32_0 = arith.constant 0 : i32
    return %arg0, %c0_i32 : i32, i32
  }
  func.func @transform_1(%arg0: i32) -> (i32, i32) {
    %c0_i32 = arith.constant 0 : i32
    %c0_i32_0 = arith.constant 0 : i32
    %c0_i32_1 = arith.constant 0 : i32
    return %c0_i32, %c0_i32_0 : i32, i32
  }
  func.func @transform_2(%arg0: i32) -> (i32, i32) {
    %c0_i32 = arith.constant 0 : i32
    %c0_i32_0 = arith.constant 0 : i32
    %c0_i32_1 = arith.constant 0 : i32
    return %c0_i32, %c0_i32_0 : i32, i32
  }
  func.func @transform_3(%arg0: i32) -> (i32, i32) {
    %c0_i32 = arith.constant 0 : i32
    %c0_i32_0 = arith.constant 0 : i32
    %c0_i32_1 = arith.constant 0 : i32
    return %c0_i32, %c0_i32_0 : i32, i32
  }
  func.func @transform_4(%arg0: i32) -> (i32, i32) {
    %c0_i32 = arith.constant 0 : i32
    %c0_i32_0 = arith.constant 0 : i32
    %c0_i32_1 = arith.constant 0 : i32
    return %c0_i32, %c0_i32_0 : i32, i32
  }
  func.func @transform_5(%arg0: i32) -> (i32, i32) {
    %c0_i32 = arith.constant 0 : i32
    %c0_i32_0 = arith.constant 0 : i32
    %c0_i32_1 = arith.constant 0 : i32
    return %c0_i32, %c0_i32_0 : i32, i32
  }
  func.func @transform_6(%arg0: i32) -> (i32, i32) {
    %c0_i32 = arith.constant 0 : i32
    %c0_i32_0 = arith.constant 0 : i32
    %c0_i32_1 = arith.constant 0 : i32
    return %c0_i32, %c0_i32_0 : i32, i32
  }
  func.func @transform_7(%arg0: i32) -> (i32, i32, i32) {
    %c0_i32 = arith.constant 0 : i32
    %c0_i32_0 = arith.constant 0 : i32
    %c0_i32_1 = arith.constant 0 : i32
    return %arg0, %c0_i32, %c0_i32_0 : i32, i32, i32
  }
}

</mosaic_0001>

<bundles_post_ra>
// kernel: autoencoder_forward.2
= control target key start
LH: loop header
LB: loop body
LE: loop exit
PB: predicated region body
PF: predicated region fallthrough
CT: control target
= control target key end

     0   :  { %s635_s15 = smov 0   ;;  %s707_s0 = inlined_call_operand.vmem [shape: s32[2,8,1], index: 0, kind: input, shape index: {}]   ;;  %s708_s1 = inlined_call_operand.vmem [shape: bf16[128,128], index: 1, kind: input, shape index: {}]   ;;  %s709_s2 = inlined_call_operand.vmem [shape: bf16[128,128], index: 2, kind: input, shape index: {}]   ;;  %s710_s3 = inlined_call_operand.vmem [shape: f32[1,128], index: 3, kind: input, shape index: {}]   ;;  %s711_s4 = inlined_call_operand.vmem [shape: bf16[2,1,128], index: 4, kind: output, shape index: {}]  }
   0x1 LB: > { %s481_s16 = sadd.s32 4294967295, %s604_s15   ;;  %p485_p0 = scmp.ge.s32.totalorder %s604_s15, 1  ;;  %s604_s15 = sphi %s635_s15, %s14_s15  }
   0x2   : > { %p161_p1 = scmp.lt.s32.totalorder %s604_s15, 3 }
   0x4   : > { %p162_p2 = pnand %p485_p0, %p161_p1 }
   0x5   : > { %p184_p3 = scmp.lt.s32.totalorder (!%p162_p2), %s481_s16, 1  ;;  %v580_v0 = vld [vmem:[%s708_s1] sm:$0xff] (!%p162_p2)   ;;  %v606_v1 = vmov (!%p162_p2), 0   ;;  %v607_v2 = vmov (!%p162_p2), 0.0   ;;  %v581_v3 = vld [vmem:[%s708_s1 + $0x8] sm:$0xff] (!%p162_p2)   ;;  %v582_v5 = vld [vmem:[%s708_s1 + $0x10] sm:$0xff] (!%p162_p2)   ;;  %v193_v18 = vlaneseq (!%p162_p2) }
   0x6   : > { %165 = sbr.rel (%p162_p2) target bundleno = 604 (0x25c), region = 36  ;;  %579 = vset.pattern.permute.xlu0 (!%p162_p2), %v606_v1  ;;  %527 = vmatprep.subr.bf16.mxu0 (!%p162_p2), %v607_v2  ;;  %vm608_vm0 = vmmov (!%p162_p2), 0   ;;  %v583_v6 = vld [vmem:[%s708_s1 + $0x18] sm:$0xff] (!%p162_p2)   ;;  %v588_v7 = vld [vmem:[%s709_s2] sm:$0xff] (!%p162_p2)   ;;  %v589_v8 = vld [vmem:[%s709_s2 + $0x8] sm:$0xff] (!%p162_p2)   ;;  %vm428_vm3 = vcmask (!%p162_p2), 1040384  }
   0x7   : > { %528 = vmatpush3.bf16.msra.mxu0 (!%p162_p2), %v580_v0  ;;  %547 = vmatprep.subr.bf16.mxu1 (!%p162_p2), %v607_v2  ;;  %v584_v9 = vld [vmem:[%s708_s1 + $0x20] sm:$0xff] (!%p162_p2)   ;;  %v590_v10 = vld [vmem:[%s709_s2 + $0x10] sm:$0xff] (!%p162_p2)   ;;  %v585_v11 = vld [vmem:[%s708_s1 + $0x28] sm:$0xff] (!%p162_p2)   ;;  %v194_v19 = vand.u32 (!%p162_p2), 127, %v193_v18  ;;  %v609_v21 = vmov (!%p162_p2), 1.0|1.0  }
   0x8   : > { %529 = vmatprep.subr.bf16.mxu0 (!%p162_p2), %v607_v2  ;;  %543 = vmatprep.mubr.msk.bf16.mxu0 (!%p162_p2), %vm608_vm0, %v607_v2  ;;  %v591_v12 = vld [vmem:[%s709_s2 + $0x18] sm:$0xff] (!%p162_p2)   ;;  %v586_v13 = vld [vmem:[%s708_s1 + $0x30] sm:$0xff] (!%p162_p2)   ;;  %v592_v14 = vld [vmem:[%s709_s2 + $0x20] sm:$0xff] (!%p162_p2)   ;;  %vm429_vm4 = vsmask.f32 (!%p162_p2), 256 }
   0x9   : > { %563 = vmatprep.mubr.msk.bf16.mxu1 (!%p162_p2), %vm608_vm0, %v607_v2  ;;  %548 = vmatpush3.bf16.msra.mxu1 (!%p162_p2), %v588_v7  ;;  %v587_v15 = vld [vmem:[%s708_s1 + $0x38] sm:$0xff] (!%p162_p2)   ;;  %v593_v16 = vld [vmem:[%s709_s2 + $0x28] sm:$0xff] (!%p162_p2)   ;;  %v594_v17 = vld [vmem:[%s709_s2 + $0x30] sm:$0xff] (!%p162_p2)  }
   0xa   : > { %549 = vmatprep.subr.bf16.mxu1 (!%p162_p2), %v607_v2  ;;  %v595_v22 = vld [vmem:[%s709_s2 + $0x38] sm:$0xff] (!%p162_p2)   ;;  %v498_v28 = vld [vmem:[%s710_s3] ss:$0 sm:$0xff] (!%p162_p2)  ;;  %vm430_vm5 = vmand (!%p162_p2), %vm428_vm3, %vm429_vm4 }
   0xb   : > { %530 = vmatpush3.bf16.msra.mxu0 (!%p162_p2), %v581_v3 }
   0xc   : > { %531 = vmatprep.subr.bf16.mxu0 (!%p162_p2), %v607_v2 }
   0xd   : > { %s713_s16 = smov (!%p184_p3, %s481_s16), 1  ;;  %550 = vmatpush3.bf16.msra.mxu1 %v589_v8 }
   0xe   : > { %s486_s21 = sshll.u32 %s713_s16, 3  ;;  %551 = vmatprep.subr.bf16.mxu1 %v607_v2  ;;  %s190_s7 = scalar_lea.vmem %s711_s4, %s713_s16 }
   0xf   : > { %s187_s24 = scalar_lea.vmem %s707_s0, %s486_s21  ;;  %532 = vmatpush3.bf16.msra.mxu0 %v582_v5  ;;  %v431_v42 = vld [vmem:[%s190_s7] sm:$0x1] }
  0x10   : > { %v192_v4 = vld [vmem:[%s187_s24] sm:$0xff]  ;;  %533 = vmatprep.subr.bf16.mxu0 %v607_v2 }
  0x11   : > { %196 = vperm.xlu0 %579, %v192_v4   ;;  %552 = vmatpush3.bf16.msra.mxu1 %v590_v10 }
  0x12   : > { %553 = vmatprep.subr.bf16.mxu1 %v607_v2 }
  0x13   : > { %534 = vmatpush3.bf16.msra.mxu0 %v583_v6 }
  0x14   : > { %535 = vmatprep.subr.bf16.mxu0 %v607_v2 }
  0x15   : > { %554 = vmatpush3.bf16.msra.mxu1 %v591_v12 }
  0x16   : > { %555 = vmatprep.subr.bf16.mxu1 %v607_v2 }
  0x17   : > { %536 = vmatpush3.bf16.msra.mxu0 %v584_v9 }
  0x18   : > { %537 = vmatprep.subr.bf16.mxu0 %v607_v2 }
  0x19   : > { %556 = vmatpush3.bf16.msra.mxu1 %v592_v14 }
  0x1a   : > { %557 = vmatprep.subr.bf16.mxu1 %v607_v2 }
  0x1b   : > { %538 = vmatpush3.bf16.msra.mxu0 %v585_v11 }
  0x1c   : > { %539 = vmatprep.subr.bf16.mxu0 %v607_v2 }
  0x1d   : > { %558 = vmatpush3.bf16.msra.mxu1 %v593_v16 }
  0x1e   : > { %559 = vmatprep.subr.bf16.mxu1 %v607_v2 }
  0x1f   : > { %540 = vmatpush3.bf16.msra.mxu0 %v586_v13 }
  0x20   : > { %541 = vmatprep.subr.bf16.mxu0 %v607_v2 }
  0x21   : > { %560 = vmatpush3.bf16.msra.mxu1 %v594_v17 }
  0x22   : > { %561 = vmatprep.subr.bf16.mxu1 %v607_v2 }
  0x23   : > { %542 = vmatpush3.bf16.msra.mxu0 %v587_v15 }
  0x25   : > { %562 = vmatpush3.bf16.msra.mxu1 %v595_v22 }
  0x90   : > { %v197_v20 = vpop.permute.xlu0 %196 }
  0x91   : > { %vm198_vm1 = vcmp.eq.s32.totalorder %v194_v19, %v197_v20 }
  0x92   : > { %vm496_vm2 = vmpackc.low %vm198_vm1, %vm198_vm1 }
  0x93   : > { %544 = vmatmul.mubr.msk.bf16.vlgmr.msra.gmra.mrb[0].mxu0 %vm496_vm2, %v609_v21 }
 0x166   : > { %v300_v23 = vpop.f32.mrb[0].mxu0 }
 0x167   : > { %v306_v24 = vpack.c.bf16 %v300_v23, %v300_v23  ;;  %v545_v25 = vpop.f32.mrb[1].mxu0 }
 0x168   : > { %v303_v26 = vpop.f32.mrb[2].mxu0 }
 0x169   : > { %v546_v27 = vpop.f32.mrb[3].mxu0  ;;  %564 = vmatmul.mubr.bf16.vlgmr.msra.gmra.mrb[0].mxu1 %v306_v24 }
 0x23c   : > { %v412_v29 = vpop.f32.mrb[0].mxu1 }
 0x23d   : > { %v413_v30 = vadd.f32 %v498_v28, %v412_v29  ;;  %v565_v31 = vpop.f32.mrb[1].mxu1 }
 0x23e   : > { %v415_v32 = vpop.f32.mrb[2].mxu1 }
 0x23f   : > { %596 = vtanh.f32 %v413_v30  ;;  %v566_v33 = vpop.f32.mrb[3].mxu1 }
 0x249   : > { %v597_v34 = vpop.eup %596 }
 0x24a   : > { %v419_v35 = vrot.slane %v597_v34, 4 }
 0x24c   : > { %v420_v36 = vadd.f32 %v597_v34, %v419_v35 }
 0x24e   : > { %v421_v37 = vrot.slane %v420_v36, 2 }
 0x250   : > { %v422_v38 = vadd.f32 %v421_v37, %v420_v36 }
 0x252   : > { %v423_v39 = vrot.slane %v422_v38, 1 }
 0x254   : > { %v424_v40 = vadd.f32 %v423_v39, %v422_v38 }
 0x256   : > { %v426_v41 = vmul.f32 0.125, %v424_v40 }
 0x258   : > { %v427_v43 = vpack.c.bf16 %v426_v41, %v426_v41 }
 0x25a   : > { %v432_v44 = vsel %vm430_vm5, %v427_v43, %v431_v42 }
 0x25b   : > { %433 = vst [vmem:[%s190_s7] sm:$0x1] %v432_v44 }
 0x25c PF: > { %s14_s15 = sadd.s32 1, %s604_s15  }
 0x25d   : > { %p11_p4 = scmp.ge.s32.totalorder %s14_s15, 4  }
 0x25f   :  { %13 = sbr.rel (!%p11_p4) target bundleno = 1 (0x1), region = 66 }

// kernel: autoencoder_forward.3
= control target key start
LH: loop header
LB: loop body
LE: loop exit
PB: predicated region body
PF: predicated region fallthrough
CT: control target
= control target key end

     0   :  { %vm104_vm0 = vcmask 1043456   ;;  %v30_v0 = vlaneseq  ;;  %v835_v1 = vmov 0   ;;  %v836_v14 = vmov 0.0   ;;  %s1012_s0 = inlined_call_operand.vmem [shape: s32[24,2], index: 0, kind: input, shape index: {}]   ;;  %s1013_s2 = inlined_call_operand.vmem [shape: bf16[8,128], index: 2, kind: input, shape index: {}]   ;;  %s1014_s1 = inlined_call_operand.vmem [shape: bf16[128,128], index: 1, kind: input, shape index: {}]   ;;  %s1015_s3 = inlined_call_operand.vmem [shape: bf16[128,128], index: 3, kind: input, shape index: {}]   ;;  %s1016_s5 = inlined_call_operand.vmem [shape: bf16[128,128], index: 5, kind: input, shape index: {}]   ;;  %s1017_s4 = inlined_call_operand.vmem [shape: f32[1,128], index: 4, kind: input, shape index: {}]   ;;  %s1018_s6 = inlined_call_operand.vmem [shape: f32[1,128], index: 6, kind: input, shape index: {}]   ;;  %s1019_s7 = inlined_call_operand.vmem [shape: f32[1,8,128], index: 7, kind: output, shape index: {}]  }
   0x1   :  { %784 = vset.pattern.permute.xlu0 %v835_v1  ;;  %v883_v2 = vld [vmem:[%s1012_s0] sm:$0xff]  ;;  %785 = vset.pattern.permute.xlu1 %v835_v1  ;;  %v888_v3 = vld [vmem:[%s1012_s0 + $0x10] sm:$0xff]  ;;  %v894_v4 = vld [vmem:[%s1012_s0 + $0x8] sm:$0xff]  ;;  %vm97_vm9 = vcmask 64512   ;;  %v837_v37 = vmov 1.0|1.0  }
   0x2   :  { %33 = vperm.xlu0 %784, %v883_v2   ;;  %39 = vperm.xlu1 %785, %v888_v3   ;;  %v96_v5 = vld [vmem:[%s1013_s2] sm:$0xf]  ;;  %v900_v6 = vand.u32 127, %v30_v0  ;;  %v902_v8 = vshrl.u32 %v30_v0, 7  ;;  %v794_v19 = vld [vmem:[%s1014_s1 + $0x8] sm:$0xff]   ;;  %v795_v23 = vld [vmem:[%s1014_s1 + $0x10] sm:$0xff]  }
   0x3   :  { %774 = vmatprep.subr.msk.bf16.mxu0 %vm104_vm0, %v96_v5  ;;  %v106_v7 = vsel %vm104_vm0, %v96_v5, 0  ;;  %v793_v10 = vld [vmem:[%s1014_s1] sm:$0xff]   ;;  %v802_v22 = vld [vmem:[%s1015_s3 + $0x8] sm:$0xff]   ;;  %v803_v24 = vld [vmem:[%s1015_s3 + $0x10] sm:$0xff]   ;;  %v838_v5 = vmov 1  }
   0x4   :  { %705 = vmatpush3.bf16.msra.mxu0 %v106_v7  ;;  %v77_v9 = vmul.u32 9, %v900_v6  ;;  %v70_v11 = vadd.s32 8, %v902_v8  ;;  %v71_v12 = vadd.s32 16, %v902_v8  ;;  %v801_v21 = vld [vmem:[%s1015_s3] sm:$0xff]   ;;  %v796_v25 = vld [vmem:[%s1014_s1 + $0x18] sm:$0xff]   ;;  %v798_v29 = vld [vmem:[%s1014_s1 + $0x28] sm:$0xff]  }
   0x5   :  { %710 = vmatprep.subr.bf16.mxu0 %v793_v10  ;;  %730 = vmatprep.subr.bf16.mxu1 %v801_v21  ;;  %v804_v26 = vld [vmem:[%s1015_s3 + $0x18] sm:$0xff]   ;;  %v797_v27 = vld [vmem:[%s1014_s1 + $0x20] sm:$0xff]   ;;  %v806_v30 = vld [vmem:[%s1015_s3 + $0x28] sm:$0xff]  }
   0x6   :  { %36 = vperm.xlu0 %784, %v894_v4   ;;  %vm78_vm1 = vcmp.ge.s32.totalorder %v902_v8, %v77_v9  ;;  %v81_v13 = vadd.s32 9, %v77_v9  ;;  %vm79_vm2 = vcmp.ge.s32.totalorder %v70_v11, %v77_v9  ;;  %vm80_vm5 = vcmp.ge.s32.totalorder %v71_v12, %v77_v9  ;;  %731 = vmatpush3.bf16.msra.mxu1 %v801_v21  ;;  %v805_v28 = vld [vmem:[%s1015_s3 + $0x20] sm:$0xff]   ;;  %v799_v31 = vld [vmem:[%s1014_s1 + $0x30] sm:$0xff]   ;;  %v800_v33 = vld [vmem:[%s1014_s1 + $0x38] sm:$0xff]  }
   0x7   :  { %732 = vmatprep.subr.bf16.mxu1 %v802_v22  ;;  %v807_v32 = vld [vmem:[%s1015_s3 + $0x30] sm:$0xff]   ;;  %v808_v38 = vld [vmem:[%s1015_s3 + $0x38] sm:$0xff]   ;;  %v809_v39 = vld [vmem:[%s1016_s5] sm:$0xff]   ;;  %786 = vset.pattern.permute.xlu1 %v838_v5 }
   0x8   :  { %vm82_vm3 = vcmp.lt.s32.totalorder %v902_v8, %v81_v13  ;;  %vm83_vm4 = vcmp.lt.s32.totalorder %v70_v11, %v81_v13  ;;  %vm84_vm6 = vcmp.lt.s32.totalorder %v71_v12, %v81_v13  ;;  %v810_v46 = vld [vmem:[%s1016_s5 + $0x8] sm:$0xff]   ;;  %v811_v47 = vld [vmem:[%s1016_s5 + $0x10] sm:$0xff]   ;;  %v812_v48 = vld [vmem:[%s1016_s5 + $0x18] sm:$0xff]  }
   0x9   :  { %vm85_vm7 = vmand %vm78_vm1, %vm82_vm3  ;;  %v813_v49 = vld [vmem:[%s1016_s5 + $0x20] sm:$0xff]   ;;  %v814_v50 = vld [vmem:[%s1016_s5 + $0x28] sm:$0xff]   ;;  %vm548_vm3 = vcmp.ne.s32.totalorder %v883_v2, 0 }
   0xa   :  { %vm86_vm8 = vmand %vm79_vm2, %vm83_vm4  ;;  %v633_v15 = vsel %vm85_vm7, 1.0, %v836_v14  ;;  %733 = vmatpush3.bf16.msra.mxu1 %v802_v22  ;;  %v815_v51 = vld [vmem:[%s1016_s5 + $0x30] sm:$0xff]   ;;  %v816_v52 = vld [vmem:[%s1016_s5 + $0x38] sm:$0xff]   ;;  %787 = vset.pattern.permute.xlu0 %v838_v5  ;;  %vm549_vm4 = vcmp.ne.s32.totalorder %v894_v4, 0  ;;  %vm616_vm7 = vcmp.eq.s32.totalorder %v902_v8, 0 }
   0xb   :  { %v634_v16 = vsel %vm86_vm8, 1.0, %v836_v14  ;;  %vm87_vm10 = vmand %vm80_vm5, %vm84_vm6  ;;  %734 = vmatprep.subr.bf16.mxu1 %v803_v24  ;;  %v650_v53 = vld [vmem:[%s1017_s4] ss:$0 sm:$0xff]  ;;  %vm550_vm5 = vcmp.ne.s32.totalorder %v888_v3, 0  ;;  %vm575_vm6 = vcmask 7168   ;;  %vm619_vm8 = vcmp.eq.s32.totalorder %v900_v6, 1 }
   0xc   :  { %v94_v17 = vpack.c.bf16 %v634_v16, %v633_v15  ;;  %v635_v18 = vsel %vm87_vm10, 1.0, %v836_v14  ;;  %v659_v7 = vld [vmem:[%s1018_s6] ss:$0 sm:$0xff]  ;;  %s839_s6 = smov 127   ;;  %vm620_vm10 = vmand %vm616_vm7, %vm619_vm8 }
   0xd   :  { %v95_v20 = vpack.c.bf16 %v635_v18, %v635_v18 }
   0xe   :  { %706 = vmatprep.mubr.msk.bf16.mxu0 %vm97_vm9, %v94_v17  ;;  %735 = vmatpush3.bf16.msra.mxu1 %v803_v24 }
   0xf   :  { %707 = vmatmul.mubr.msk.bf16.vlgmr.msra.gmra.mrb[0].mxu0 %vm97_vm9, %v95_v20  ;;  %736 = vmatprep.subr.bf16.mxu1 %v804_v26  ;;  %vm617_vm9 = vcmp.eq.s32.totalorder %v900_v6, 0 }
  0x10   :  { %711 = vmatpush3.bf16.msra.mxu0 %v793_v10 }
  0x11   :  { %712 = vmatprep.subr.bf16.mxu0 %v794_v19 }
  0x12   :  { %737 = vmatpush3.bf16.msra.mxu1 %v804_v26 }
  0x13   :  { %738 = vmatprep.subr.bf16.mxu1 %v805_v28 }
  0x14   :  { %713 = vmatpush3.bf16.msra.mxu0 %v794_v19 }
  0x15   :  { %714 = vmatprep.subr.bf16.mxu0 %v795_v23 }
  0x16   :  { %739 = vmatpush3.bf16.msra.mxu1 %v805_v28 }
  0x17   :  { %740 = vmatprep.subr.bf16.mxu1 %v806_v30 }
  0x18   :  { %715 = vmatpush3.bf16.msra.mxu0 %v795_v23 }
  0x19   :  { %716 = vmatprep.subr.bf16.mxu0 %v796_v25 }
  0x1a   :  { %741 = vmatpush3.bf16.msra.mxu1 %v806_v30 }
  0x1b   :  { %742 = vmatprep.subr.bf16.mxu1 %v807_v32 }
  0x1c   :  { %717 = vmatpush3.bf16.msra.mxu0 %v796_v25 }
  0x1d   :  { %718 = vmatprep.subr.bf16.mxu0 %v797_v27 }
  0x1e   :  { %743 = vmatpush3.bf16.msra.mxu1 %v807_v32 }
  0x1f   :  { %744 = vmatprep.subr.bf16.mxu1 %v808_v38 }
  0x20   :  { %719 = vmatpush3.bf16.msra.mxu0 %v797_v27 }
  0x21   :  { %720 = vmatprep.subr.bf16.mxu0 %v798_v29 }
  0x22   :  { %745 = vmatpush3.bf16.msra.mxu1 %v808_v38 }
  0x23   :  { %750 = vmatprep.subr.bf16.mxu1 %v809_v39 }
  0x24   :  { %721 = vmatpush3.bf16.msra.mxu0 %v798_v29 }
  0x25   :  { %722 = vmatprep.subr.bf16.mxu0 %v799_v31 }
  0x28   :  { %723 = vmatpush3.bf16.msra.mxu0 %v799_v31 }
  0x29   :  { %724 = vmatprep.subr.bf16.mxu0 %v800_v33 }
  0x2c   :  { %725 = vmatpush3.bf16.msra.mxu0 %v800_v33 }
  0x81   :  { %v34_v34 = vpop.permute.xlu0 %33  ;;  %v40_v35 = vpop.permute.xlu1 %39 }
  0x82   :  { %vm43_vm11 = vcmp.eq.s32.totalorder %v900_v6, %v40_v35  ;;  %vm41_vm12 = vcmp.eq.s32.totalorder %v900_v6, %v34_v34 }
  0x83   :  { %vm648_vm14 = vmpackc.low %vm43_vm11, %vm43_vm11 }
  0x84   :  { %vm618_vm11 = vmand %vm616_vm7, %vm617_vm9 }
  0x85   :  { %v37_v36 = vpop.permute.xlu0 %36 }
  0x86   :  { %vm42_vm13 = vcmp.eq.s32.totalorder %v900_v6, %v37_v36 }
  0x87   :  { %vm646_vm15 = vmpackc.low %vm42_vm13, %vm41_vm12 }
  0x88   :  { %726 = vmatprep.mubr.msk.bf16.mxu0 %vm646_vm15, %v837_v37 }
  0x89   :  { %727 = vmatmul.mubr.msk.bf16.vlgmr.msra.gmra.mrb[0].mxu0 %vm648_vm14, %v837_v37 }
 0x15c   :  { %v728_v40 = vpop.f32.mrb[0].mxu0 }
 0x15d   :  { %v238_v41 = vpop.f32.mrb[1].mxu0  ;;  %v253_v45 = vpack.c.bf16 %v728_v40, %v728_v40 }
 0x15e   :  { %v729_v42 = vpop.f32.mrb[2].mxu0 }
 0x15f   :  { %v241_v43 = vpop.f32.mrb[3].mxu0 }
 0x160   :  { %v252_v44 = vpack.c.bf16 %v241_v43, %v238_v41 }
 0x162   :  { %746 = vmatprep.mubr.bf16.mxu1 %v252_v44  ;;  %v668_v44 = vsel %vm548_vm3, 1.0, %v836_v14 }
 0x163   :  { %747 = vmatmul.mubr.bf16.vlgmr.msra.gmra.mrb[0].mxu1 %v253_v45 }
 0x164   :  { %751 = vmatpush3.bf16.msra.mxu1 %v809_v39 }
 0x165   :  { %752 = vmatprep.subr.bf16.mxu1 %v810_v46 }
 0x168   :  { %753 = vmatpush3.bf16.msra.mxu1 %v810_v46 }
 0x169   :  { %754 = vmatprep.subr.bf16.mxu1 %v811_v47 }
 0x16c   :  { %755 = vmatpush3.bf16.msra.mxu1 %v811_v47 }
 0x16d   :  { %756 = vmatprep.subr.bf16.mxu1 %v812_v48 }
 0x170   :  { %757 = vmatpush3.bf16.msra.mxu1 %v812_v48 }
 0x171   :  { %758 = vmatprep.subr.bf16.mxu1 %v813_v49 }
 0x174   :  { %759 = vmatpush3.bf16.msra.mxu1 %v813_v49  ;;  %v669_v49 = vsel %vm549_vm4, 1.0, %v836_v14 }
 0x175   :  { %760 = vmatprep.subr.bf16.mxu1 %v814_v50 }
 0x178   :  { %761 = vmatpush3.bf16.msra.mxu1 %v814_v50 }
 0x179   :  { %762 = vmatprep.subr.bf16.mxu1 %v815_v51 }
 0x17c   :  { %763 = vmatpush3.bf16.msra.mxu1 %v815_v51 }
 0x17d   :  { %764 = vmatprep.subr.bf16.mxu1 %v816_v52 }
 0x180   :  { %765 = vmatpush3.bf16.msra.mxu1 %v816_v52 }
 0x236   :  { %v748_v54 = vpop.f32.mrb[0].mxu1 }
 0x237   :  { %v368_v55 = vadd.f32 %v748_v54, %v650_v53  ;;  %v359_v56 = vpop.f32.mrb[1].mxu1 }
 0x238   :  { %v360_v57 = vadd.f32 %v650_v53, %v359_v56  ;;  %v749_v58 = vpop.f32.mrb[2].mxu1  ;;  %v670_v56 = vsel %vm550_vm5, 1.0, %v836_v14 }
 0x239   :  { %v362_v59 = vpop.f32.mrb[3].mxu1  ;;  %817 = vtanh.f32 %v368_v55 }
 0x23a   :  { %v363_v60 = vadd.f32 %v650_v53, %v362_v59  ;;  %819 = vtanh.f32 %v360_v57 }
 0x23c   :  { %821 = vtanh.f32 %v363_v60 }
 0x243   :  { %v818_v61 = vpop.eup %817 }
 0x244   :  { %v820_v62 = vpop.eup %819  ;;  %v377_v1 = vpack.c.bf16 %v818_v61, %v818_v61 }
 0x246   :  { %v822_v63 = vpop.eup %821 }
 0x247   :  { %v376_v0 = vpack.c.bf16 %v822_v63, %v820_v62 }
 0x249   :  { %766 = vmatprep.mubr.bf16.mxu1 %v376_v0 }
 0x24a   :  { %767 = vmatmul.mubr.bf16.vlgmr.msra.gmra.mrb[4].mxu1 %v377_v1 }
 0x31d   :  { %v768_v9 = vpop.f32.mrb[4].mxu1 }
 0x31e   :  { %v483_v10 = vpop.f32.mrb[5].mxu1  ;;  %v492_v16 = vadd.f32 %v768_v9, %v659_v7 }
 0x31f   :  { %v484_v11 = vadd.f32 %v659_v7, %v483_v10  ;;  %v769_v12 = vpop.f32.mrb[6].mxu1 }
 0x320   :  { %v486_v13 = vpop.f32.mrb[7].mxu1 }
 0x321   :  { %v487_v15 = vadd.f32 %v659_v7, %v486_v13  ;;  %497 = vmax.xlane.f32.xlu1 %v484_v11 }
 0x323   :  { %499 = vmax.xlane.f32.xlu0 %v487_v15 }
 0x327   :  { %501 = vmax.xlane.f32.xlu0 %v492_v16 }
 0x332   :  { %528 = vperm.xlu1 %786, %v883_v2  }
 0x336   :  { %534 = vperm.xlu1 %786, %v888_v3  }
 0x33d   :  { %531 = vperm.xlu0 %787, %v894_v4   ;;  %v788_v4 = vpack.i.bf16 %v669_v49, %v668_v44 }
 0x3ae   :  { %v498_v17 = vpop.xlane.xlu1 %497 }
 0x3af   :  { %v503_v18 = vsub.f32 %v484_v11, %v498_v17 }
 0x3b0   :  { %v500_v19 = vpop.xlane.xlu0 %499 }
 0x3b1   :  { %v506_v20 = vmul.f32 1.442695, %v503_v18  ;;  %v504_v21 = vsub.f32 %v487_v15, %v500_v19 }
 0x3b2   :  { %v529_v28 = vpop.permute.xlu1 %528 }
 0x3b3   :  { %823 = vpow2.f32 %v506_v20  ;;  %v508_v22 = vmul.f32 1.442695, %v504_v21  ;;  %vm536_vm0 = vcmp.eq.s32.totalorder %v900_v6, %v529_v28 }
 0x3b4   :  { %v502_v23 = vpop.xlane.xlu0 %501  ;;  %v539_v31 = vsel %vm536_vm0, %v484_v11, 0.0 }
 0x3b5   :  { %825 = vpow2.f32 %v508_v22  ;;  %v505_v24 = vsub.f32 %v492_v16, %v502_v23 }
 0x3b6   :  { %v535_v32 = vpop.permute.xlu1 %534 }
 0x3b7   :  { %v510_v25 = vmul.f32 1.442695, %v505_v24  ;;  %vm538_vm2 = vcmp.eq.s32.totalorder %v900_v6, %v535_v32 }
 0x3b8   :  { %v541_v34 = vsel %vm538_vm2, %v492_v16, 0.0 }
 0x3b9   :  { %827 = vpow2.f32 %v510_v25 }
 0x3bc   :  { %v532_v30 = vpop.permute.xlu0 %531 }
 0x3bd   :  { %v824_v26 = vpop.eup %823  ;;  %vm537_vm1 = vcmp.eq.s32.totalorder %v900_v6, %v532_v30 }
 0x3be   :  { %512 = vadd.xlane.f32.xlu1 %v824_v26  ;;  %v540_v33 = vsel %vm537_vm1, %v487_v15, 0.0 }
 0x3bf   :  { %v826_v27 = vpop.eup %825 }
 0x3c0   :  { %514 = vadd.xlane.f32.xlu0 %v826_v27 }
 0x3c3   :  { %v828_v29 = vpop.eup %827 }
 0x3c4   :  { %516 = vadd.xlane.f32.xlu1 %v828_v29 }
 0x3c8   :  { %542 = vadd.xlane.f32.xlu1 %v539_v31 }
 0x3cc   :  { %544 = vadd.xlane.f32.xlu1 %v540_v33 }
 0x3d0   :  { %546 = vadd.xlane.f32.xlu1 %v541_v34 }
 0x44b   :  { %v513_v35 = vpop.xlane.xlu1 %512 }
 0x44c   :  { %829 = vlog2.f32 %v513_v35 }
 0x44d   :  { %v515_v36 = vpop.xlane.xlu0 %514 }
 0x44e   :  { %831 = vlog2.f32 %v515_v36 }
 0x451   :  { %v517_v37 = vpop.xlane.xlu1 %516 }
 0x452   :  { %833 = vlog2.f32 %v517_v37 }
 0x455   :  { %v543_v38 = vpop.xlane.xlu1 %542 }
 0x456   :  { %v830_v39 = vpop.eup %829 }
 0x457   :  { %v519_v40 = vmul.f32 0.6931472, %v830_v39 }
 0x458   :  { %v832_v41 = vpop.eup %831 }
 0x459   :  { %v521_v42 = vmul.f32 0.6931472, %v832_v41  ;;  %v524_v43 = vadd.f32 %v519_v40, %v498_v17  ;;  %v545_v45 = vpop.xlane.xlu1 %544 }
 0x45b   :  { %v557_v46 = vsub.f32 %v524_v43, %v543_v38  ;;  %v525_v47 = vadd.f32 %v521_v42, %v500_v19 }
 0x45c   :  { %v834_v48 = vpop.eup %833 }
 0x45d   :  { %v523_v50 = vmul.f32 0.6931472, %v834_v48  ;;  %v560_v51 = vmul.f32 %v668_v44, %v557_v46  ;;  %v558_v52 = vsub.f32 %v525_v47, %v545_v45  ;;  %v547_v54 = vpop.xlane.xlu1 %546 }
 0x45f   :  { %v561_v2 = vmul.f32 %v669_v49, %v558_v52  ;;  %v526_v53 = vadd.f32 %v523_v50, %v502_v23  ;;  %566 = vrot.lane.b32.xlu1 %v560_v51, %s839_s6 }
 0x461   :  { %v559_v55 = vsub.f32 %v526_v53, %v547_v54  ;;  %568 = vrot.lane.b32.xlu0 %v561_v2, %s839_s6 }
 0x463   :  { %789 = vrot.lane.b32.xlu1 %v788_v4, %s839_s6  ;;  %v562_v57 = vmul.f32 %v670_v56, %v559_v55 }
 0x467   :  { %570 = vrot.lane.b32.xlu1 %v562_v57, %s839_s6 }
 0x46b   :  { %597 = vrot.lane.b32.xlu1 %v670_v56, %s839_s6 }
 0x4d1   :  { %v567_v58 = vpop.permute.xlu1 %566 }
 0x4d2   :  { %v576_v63 = vsel %vm575_vm6, %v567_v58, 0.0 }
 0x4d3   :  { %v569_v59 = vpop.permute.xlu0 %568 }
 0x4d4   :  { %v577_v61 = vsel %vm575_vm6, %v569_v59, 0.0 }
 0x4d5   :  { %v790_v60 = vpop.permute.xlu1 %789  ;;  %v578_v0 = vadd.f32 %v577_v61, %v576_v63 }
 0x4d6   :  { %v792_v3 = vunpack.i.h.bf16 %v790_v60  ;;  %v791_v62 = vunpack.i.l.bf16 %v790_v60 }
 0x4d8   :  { %v603_v5 = vsel %vm575_vm6, %v792_v3, 0.0  ;;  %v602_v7 = vsel %vm575_vm6, %v791_v62, 0.0 }
 0x4d9   :  { %v571_v1 = vpop.permute.xlu1 %570  ;;  %v604_v11 = vadd.f32 %v603_v5, %v602_v7 }
 0x4da   :  { %v579_v9 = vsel %vm575_vm6, %v571_v1, 0.0 }
 0x4db   :  { %v580_v10 = vadd.f32 %v579_v9, %v578_v0 }
 0x4dd   :  { %581 = vadd.xlane.f32.xlu0 %v580_v10  ;;  %v598_v14 = vpop.permute.xlu1 %597 }
 0x4de   :  { %v605_v12 = vsel %vm575_vm6, %v598_v14, 0.0 }
 0x4df   :  { %v606_v13 = vadd.f32 %v605_v12, %v604_v11 }
 0x4e1   :  { %607 = vadd.xlane.f32.xlu1 %v606_v13 }
 0x56a   :  { %v582_v15 = vpop.xlane.xlu0 %581 }
 0x56b   :  { %v583_v16 = vrot.slane %v582_v15, 4 }
 0x56d   :  { %v584_v17 = vadd.f32 %v583_v16, %v582_v15 }
 0x56e   :  { %v608_v18 = vpop.xlane.xlu1 %607 }
 0x56f   :  { %v585_v19 = vrot.slane %v584_v17, 2  ;;  %v609_v20 = vrot.slane %v608_v18, 4 }
 0x571   :  { %v610_v21 = vadd.f32 %v609_v20, %v608_v18  ;;  %v586_v22 = vadd.f32 %v585_v19, %v584_v17 }
 0x573   :  { %v611_v23 = vrot.slane %v610_v21, 2  ;;  %v587_v24 = vrot.slane %v586_v22, 1 }
 0x575   :  { %v612_v25 = vadd.f32 %v611_v23, %v610_v21  ;;  %v588_v26 = vadd.f32 %v587_v24, %v586_v22 }
 0x577   :  { %775 = vpush %v588_v26  ;;  %v613_v27 = vrot.slane %v612_v25, 1 }
 0x579   :  { %v614_v28 = vadd.f32 %v613_v27, %v612_v25 }
 0x57b   :  { %777 = vpush %v614_v28 }
 0x5a8   :  { %s776_s30 = spop %775 }
 0x5a9   :  { %v623_v30 = vstv %s776_s30 }
 0x5ac   :  { %s778_s8 = spop %777 }
 0x5ad   :  { %v621_v29 = vstv %s778_s8 }
 0x5ae   :  { %v622_v31 = vsel %vm620_vm10, %v621_v29, 0.0 }
 0x5af   :  { %v624_v32 = vsel %vm618_vm11, %v623_v30, %v622_v31 }
 0x5b0   :  { %625 = vst [vmem:[%s1019_s7] sm:$0xff] %v624_v32 }

</bundles_post_ra>
